<compile_context>
chip_gen: v7x
topology: tpu7x:2x2x1
jax: 0.10.0
libtpu: 0.0.40
codegen_flags: <defaults>
</compile_context>

<pallas_src>
import functools
from typing import NamedTuple

import jax
import jax.numpy as jnp
from jax.experimental import pallas as pl
from jax.experimental.pallas import tpu as pltpu

_LANE = 128
_SUBLANE = 8


def _round_up(v, m):
    return ((v + m - 1) // m) * m


def _vmem_limit_bytes():
    """Generation-aware VMEM request with headroom for compiler scratch."""
    try:
        cap = pltpu.get_tpu_info().vmem_capacity_bytes  # 64 MiB v7x, 128 MiB v5e/v6e
    except Exception:
        cap = 128 * 1024 * 1024
    # ~75% of physical, capped, leaving room for internal scratch / spills.
    return int(min(cap * 3 // 4, 112 * 1024 * 1024))


class TwoLayerParams(NamedTuple):
    w1: jax.Array  # (d_in_p, h_p)    model dtype, zero-padded
    b1: jax.Array  # (1, h_p)         float32, zero-padded
    w2: jax.Array  # (h_p, d_out_p)   model dtype, zero-padded
    b2: jax.Array  # (1, d_out_p)     float32, padded cols = -1e30 softmax sentinel


def prepare_params(w1, b1, w2, b2, dtype=None):
    """Pad parameters to lane width ONCE, outside the per-call forward path."""
    d_in, h = w1.shape
    d_out = w2.shape[1]
    dtype = dtype or w1.dtype
    d_in_p, h_p, d_out_p = (_round_up(d, _LANE) for d in (d_in, h, d_out))
    w1_p = jnp.zeros((d_in_p, h_p), dtype).at[:d_in, :h].set(w1.astype(dtype))
    w2_p = jnp.zeros((h_p, d_out_p), dtype).at[:h, :d_out].set(w2.astype(dtype))
    b1_p = jnp.zeros((1, h_p), jnp.float32).at[0, :h].set(b1.astype(jnp.float32))
    b2_p = jnp.full((1, d_out_p), -1e30, jnp.float32).at[0, :d_out].set(
        b2.astype(jnp.float32))
    return TwoLayerParams(w1_p, b1_p, w2_p, b2_p)


def _fused_kernel(x_ref, w1_ref, b1_ref, w2_ref, b2_ref, o_ref):
    """Both weights VMEM-resident; one batch tile per grid step."""
    h = jnp.dot(x_ref[...], w1_ref[...], preferred_element_type=jnp.float32)
    # bias + ReLU + downcast fused (single (tn, H) intermediate stays live).
    h = jnp.maximum(h + b1_ref[...], 0.0).astype(w2_ref.dtype)
    y = jnp.dot(h, w2_ref[...], preferred_element_type=jnp.float32) + b2_ref[...]
    # Numerically-stable softmax over features (PyTorch dim=1); padded output
    # columns carry a -1e30 bias so they get probability 0.  Exact divide so
    # rows sum to 1 within f32 rounding.
    y = y - jnp.max(y, axis=-1, keepdims=True)
    e = jnp.exp(y)
    o_ref[...] = (e / jnp.sum(e, axis=-1, keepdims=True)).astype(o_ref.dtype)


def _ktiled_kernel(x_ref, w1_ref, b1_ref, w2_ref, b2_ref, o_ref, acc_ref):
    """Weights streamed over a hidden-dim grid axis; f32 accumulator in scratch."""
    k = pl.program_id(1)

    @pl.when(k == 0)
    def _():
        acc_ref[...] = jnp.zeros_like(acc_ref)

    h = jnp.dot(x_ref[...], w1_ref[...], preferred_element_type=jnp.float32)
    h = jnp.maximum(h + b1_ref[...], 0.0).astype(w2_ref.dtype)
    acc_ref[...] += jnp.dot(h, w2_ref[...], preferred_element_type=jnp.float32)

    @pl.when(k == pl.num_programs(1) - 1)
    def _():
        y = acc_ref[...] + b2_ref[...]
        y = y - jnp.max(y, axis=-1, keepdims=True)
        e = jnp.exp(y)
        o_ref[...] = (e / jnp.sum(e, axis=-1, keepdims=True)).astype(o_ref.dtype)


@functools.partial(
    jax.jit, static_argnames=("d_out", "tile_n", "hidden_tile", "force_ktiled"))
def two_layer_net(x, params, d_out, *, tile_n=1024, hidden_tile=512,
                  force_ktiled=False):
    """x: (N, D_in); params: TwoLayerParams from prepare_params; d_out: static int."""
    n, d_in = x.shape
    w1_p, b1_p, w2_p, b2_p = params
    d_in_p, h_p = w1_p.shape
    d_out_p = w2_p.shape[1]
    dtype = x.dtype
    itemsize = jnp.dtype(dtype).itemsize

    vmem_limit = _vmem_limit_bytes()

    # Resident (single-buffered) weight footprint; switch to the K-tiled
    # streaming variant when it would eat too much of the VMEM budget.
    resident_bytes = (w1_p.size + w2_p.size) * itemsize + (b1_p.size + b2_p.size) * 4
    use_ktiled = force_ktiled or resident_bytes > (vmem_limit * 45) // 100

    # Per-batch-row VMEM cost of a grid step: double-buffered x/out tiles,
    # f32 hidden intermediate (+ narrow copy), f32 logits.
    per_row = (2 * (d_in_p + d_out_p) * itemsize
               + h_p * 4 + h_p * itemsize + d_out_p * 4)
    weight_budget = 0 if use_ktiled else resident_bytes
    budget = max(vmem_limit - weight_budget - (4 << 20), _SUBLANE * per_row)
    tn_cap = max(_SUBLANE, (budget // per_row) // _SUBLANE * _SUBLANE)

    tn = max(_SUBLANE, min(_round_up(tile_n, _SUBLANE),
                           _round_up(n, _SUBLANE), tn_cap))
    # v7x megacore: keep >=2 batch grid steps so both TensorCores get work.
    if n > _SUBLANE:
        tn = min(tn, max(_SUBLANE, _round_up((n + 1) // 2, _SUBLANE)))
    n_p = _round_up(n, tn)

    # Pad x only when needed (skip the extra HBM round-trip if already aligned).
    if (n_p, d_in_p) == (n, d_in):
        x_p = x
    else:
        x_p = jnp.zeros((n_p, d_in_p), dtype).at[:n, :d_in].set(x)

    # TODO(synk): optional bf16 cast of f32 activations/weights (MXU-native
    # throughput) is left to the caller to preserve the module's numerics.

    compiler_params_kwargs = dict(vmem_limit_bytes=vmem_limit)

    if not use_ktiled:
        grid = (n_p // tn,)
        cost = pl.CostEstimate(
            flops=2 * n_p * (d_in_p * h_p + h_p * d_out_p),
            transcendentals=n_p * d_out_p,
            bytes_accessed=(x_p.size + w1_p.size + w2_p.size + n_p * d_out_p)
            * itemsize + (b1_p.size + b2_p.size) * 4,
        )
        invariant = dict(pipeline_mode=pl.Buffered(1))  # grid-invariant -> 1 buffer
        out_p = pl.pallas_call(
            _fused_kernel,
            out_shape=jax.ShapeDtypeStruct((n_p, d_out_p), dtype),
            grid_spec=pltpu.PrefetchScalarGridSpec(
                num_scalar_prefetch=0,
                grid=grid,
                in_specs=[
                    pl.BlockSpec((tn, d_in_p), lambda i: (i, 0)),      # x batch tile
                    pl.BlockSpec((d_in_p, h_p), lambda i: (0, 0), **invariant),
                    pl.BlockSpec((1, h_p), lambda i: (0, 0), **invariant),
                    pl.BlockSpec((h_p, d_out_p), lambda i: (0, 0), **invariant),
                    pl.BlockSpec((1, d_out_p), lambda i: (0, 0), **invariant),
                ],
                out_specs=pl.BlockSpec((tn, d_out_p), lambda i: (i, 0)),
            ),
            compiler_params=pltpu.CompilerParams(
                dimension_semantics=("parallel",), **compiler_params_kwargs),
            cost_estimate=cost,
        )(x_p, w1_p, b1_p, w2_p, b2_p)
    else:
        # Stream weights over the hidden (contraction of matmul2 / output of
        # matmul1) dimension; f32 logit accumulator in scratch.
        tk = min(_round_up(hidden_tile, _LANE), h_p)
        while h_p % tk:
            tk -= _LANE  # 128 always divides h_p
        nk = h_p // tk
        grid = (n_p // tn, nk)
        cost = pl.CostEstimate(
            flops=2 * n_p * (d_in_p * h_p + h_p * d_out_p),
            transcendentals=n_p * d_out_p,
            bytes_accessed=(x_p.size + (n_p // tn) * (w1_p.size + w2_p.size)
                            + n_p * d_out_p) * itemsize
            + (b1_p.size + b2_p.size) * 4,
        )
        out_p = pl.pallas_call(
            _ktiled_kernel,
            out_shape=jax.ShapeDtypeStruct((n_p, d_out_p), dtype),
            grid_spec=pltpu.PrefetchScalarGridSpec(
                num_scalar_prefetch=0,
                grid=grid,
                in_specs=[
                    pl.BlockSpec((tn, d_in_p), lambda i, k: (i, 0)),
                    pl.BlockSpec((d_in_p, tk), lambda i, k: (0, k)),   # w1 streamed
                    pl.BlockSpec((1, tk), lambda i, k: (0, k)),        # b1 streamed
                    pl.BlockSpec((tk, d_out_p), lambda i, k: (k, 0)),  # w2 streamed
                    pl.BlockSpec((1, d_out_p), lambda i, k: (0, 0),
                                 pipeline_mode=pl.Buffered(1)),        # b2 invariant
                ],
                out_specs=pl.BlockSpec((tn, d_out_p), lambda i, k: (i, 0)),
                scratch_shapes=[pltpu.VMEM((tn, d_out_p), jnp.float32)],
            ),
            compiler_params=pltpu.CompilerParams(
                dimension_semantics=("parallel", "arbitrary"),
                **compiler_params_kwargs),
            cost_estimate=cost,
        )(x_p, w1_p, b1_p, w2_p, b2_p)

    if (n_p, d_out_p) == (n, d_out):
        return out_p
    return out_p[:n, :d_out]


def init_params(key, d_in, h, d_out, dtype=jnp.float32):
    """nn.Linear-style init (uniform +/- 1/sqrt(fan_in)); weights stored (in, out)."""
    k1, k2, k3, k4 = jax.random.split(key, 4)
    bound1 = 1.0 / jnp.sqrt(jnp.float32(d_in))
    bound2 = 1.0 / jnp.sqrt(jnp.float32(h))
    w1 = jax.random.uniform(k1, (d_in, h), dtype, -bound1, bound1)
    b1 = jax.random.uniform(k2, (h,), dtype, -bound1, bound1)
    w2 = jax.random.uniform(k3, (h, d_out), dtype, -bound2, bound2)
    b2 = jax.random.uniform(k4, (d_out,), dtype, -bound2, bound2)
    return w1, b1, w2, b2


if __name__ == "__main__":
    # Small shapes consistent with the module: batch=8, D_in=16, H=32, D_out=8.
    N, D_IN, H, D_OUT = 8, 16, 32, 8

    key = jax.random.PRNGKey(0)
    kx, kp = jax.random.split(key)
    x = jax.random.normal(kx, (N, D_IN), jnp.float32)
    w1, b1, w2, b2 = init_params(kp, D_IN, H, D_OUT)

    def ref_fwd(x_, w1_, b1_, w2_, b2_):
        h_ = jnp.maximum(
            x_.astype(jnp.float32) @ w1_.astype(jnp.float32) + b1_.astype(jnp.float32),
            0.0)
        y_ = h_ @ w2_.astype(jnp.float32) + b2_.astype(jnp.float32)
        return jax.nn.softmax(y_, axis=1)

    # 1) f32, VMEM-resident weights (single grid step).
    params = prepare_params(w1, b1, w2, b2)
    out = jax.block_until_ready(two_layer_net(x, params, d_out=D_OUT))
    ref = ref_fwd(x, w1, b1, w2, b2)
    assert out.shape == (N, D_OUT)
    assert jnp.allclose(out, ref, atol=1e-3, rtol=1e-3)
    assert jnp.allclose(jnp.sum(out, axis=1), 1.0, atol=1e-3)

    # 2) bf16 MXU path (bf16 activations/weights, f32 accumulation + epilogue).
    xb = x.astype(jnp.bfloat16)
    params_bf16 = prepare_params(
        w1.astype(jnp.bfloat16), b1, w2.astype(jnp.bfloat16), b2)
    out_bf16 = jax.block_until_ready(two_layer_net(xb, params_bf16, d_out=D_OUT))
    ref_bf16 = ref_fwd(xb, w1.astype(jnp.bfloat16), b1, w2.astype(jnp.bfloat16), b2)
    assert out_bf16.dtype == jnp.bfloat16
    assert jnp.allclose(out_bf16.astype(jnp.float32), ref_bf16, atol=2e-2)

    # 3) Batch that does not divide the tile (padding path, multi-step grid).
    N2 = 20
    x2 = jax.random.normal(jax.random.PRNGKey(1), (N2, D_IN), jnp.float32)
    out2 = jax.block_until_ready(two_layer_net(x2, params, d_out=D_OUT, tile_n=16))
    ref2 = ref_fwd(x2, w1, b1, w2, b2)
    assert out2.shape == (N2, D_OUT)
    assert jnp.allclose(out2, ref2, atol=1e-3, rtol=1e-3)
    assert jnp.allclose(jnp.sum(out2, axis=1), 1.0, atol=1e-3)

    # 4) K-tiled streaming-weights path (forced small so it is exercised here):
    #    hidden dim padded to 384 -> 3 hidden tiles of 128, 2 batch steps.
    N3, D_IN3, H3, D_OUT3 = 24, 16, 300, 10
    kx3, kp3 = jax.random.split(jax.random.PRNGKey(2))
    x3 = jax.random.normal(kx3, (N3, D_IN3), jnp.float32)
    w13, b13, w23, b23 = init_params(kp3, D_IN3, H3, D_OUT3)
    params3 = prepare_params(w13, b13, w23, b23)
    out3 = jax.block_until_ready(
        two_layer_net(x3, params3, d_out=D_OUT3, hidden_tile=128, force_ktiled=True))
    ref3 = ref_fwd(x3, w13, b13, w23, b23)
    assert out3.shape == (N3, D_OUT3)
    assert jnp.allclose(out3, ref3, atol=1e-3, rtol=1e-3)
    assert jnp.allclose(jnp.sum(out3, axis=1), 1.0, atol=1e-3)

    print("KERNEL_OK")
</pallas_src>

<mosaic_0001>
module attributes {stable_mosaic.version = 11 : i64} {
  func.func @_fused_kernel(%arg0: i32, %arg1: memref<8x128xf32, #tpu.memory_space<vmem>>, %arg2: memref<128x128xf32, #tpu.memory_space<vmem>>, %arg3: memref<1x128xf32, #tpu.memory_space<vmem>>, %arg4: memref<128x128xf32, #tpu.memory_space<vmem>>, %arg5: memref<1x128xf32, #tpu.memory_space<vmem>>, %arg6: memref<8x128xf32, #tpu.memory_space<vmem>>) attributes {dimension_semantics = [#tpu.dimension_semantics<parallel>], iteration_bounds = array<i64: 1>, scalar_prefetch = 0 : i64, scratch_operands = 0 : i64, tpu.core_type = #tpu.core_type<tc>, window_params = [{transform_indices = @transform_0, window_bounds = array<i64: 8, 128>}, {pipeline_mode = #tpu.pipeline_mode<synchronous>, transform_indices = @transform_1, window_bounds = array<i64: 128, 128>}, {pipeline_mode = #tpu.pipeline_mode<synchronous>, transform_indices = @transform_2, window_bounds = array<i64: 1, 128>}, {pipeline_mode = #tpu.pipeline_mode<synchronous>, transform_indices = @transform_3, window_bounds = array<i64: 128, 128>}, {pipeline_mode = #tpu.pipeline_mode<synchronous>, transform_indices = @transform_4, window_bounds = array<i64: 1, 128>}, {transform_indices = @transform_5, window_bounds = array<i64: 8, 128>}]} {
    %c0 = arith.constant 0 : index
    %c0_0 = arith.constant 0 : index
    %0 = vector.load %arg1[%c0, %c0_0] : memref<8x128xf32, #tpu.memory_space<vmem>>, vector<8x128xf32>
    %c0_1 = arith.constant 0 : index
    %c0_2 = arith.constant 0 : index
    %1 = vector.load %arg2[%c0_1, %c0_2] : memref<128x128xf32, #tpu.memory_space<vmem>>, vector<128x128xf32>
    %cst = arith.constant dense<0.000000e+00> : vector<8x128xf32>
    %2 = tpu.matmul %0, %1, %cst {dimension_numbers = #tpu.dot_dimension_numbers<[1], [0], [0], [1], [0, 0, 1, 1], [], []>} : vector<8x128xf32>, vector<128x128xf32>, vector<8x128xf32> -> vector<8x128xf32>
    %c0_3 = arith.constant 0 : index
    %c0_4 = arith.constant 0 : index
    %3 = vector.load %arg3[%c0_3, %c0_4] : memref<1x128xf32, #tpu.memory_space<vmem>>, vector<1x128xf32>
    %4 = vector.broadcast %3 : vector<1x128xf32> to vector<8x128xf32>
    %5 = arith.addf %2, %4 : vector<8x128xf32>
    %cst_5 = arith.constant 0.000000e+00 : f32
    %6 = vector.broadcast %cst_5 : f32 to vector<8x128xf32>
    %7 = arith.maximumf %5, %6 : vector<8x128xf32>
    %c0_6 = arith.constant 0 : index
    %c0_7 = arith.constant 0 : index
    %8 = vector.load %arg4[%c0_6, %c0_7] : memref<128x128xf32, #tpu.memory_space<vmem>>, vector<128x128xf32>
    %cst_8 = arith.constant dense<0.000000e+00> : vector<8x128xf32>
    %9 = tpu.matmul %7, %8, %cst_8 {dimension_numbers = #tpu.dot_dimension_numbers<[1], [0], [0], [1], [0, 0, 1, 1], [], []>} : vector<8x128xf32>, vector<128x128xf32>, vector<8x128xf32> -> vector<8x128xf32>
    %c0_9 = arith.constant 0 : index
    %c0_10 = arith.constant 0 : index
    %10 = vector.load %arg5[%c0_9, %c0_10] : memref<1x128xf32, #tpu.memory_space<vmem>>, vector<1x128xf32>
    %11 = vector.broadcast %10 : vector<1x128xf32> to vector<8x128xf32>
    %12 = arith.addf %9, %11 : vector<8x128xf32>
    %cst_11 = arith.constant dense<0xFF800000> : vector<8xf32>
    %13 = vector.multi_reduction <maximumf>, %12, %cst_11 [1] : vector<8x128xf32> to vector<8xf32>
    %14 = vector.shape_cast %13 : vector<8xf32> to vector<8x1xf32>
    %15 = vector.broadcast %14 : vector<8x1xf32> to vector<8x128xf32>
    %16 = arith.subf %12, %15 : vector<8x128xf32>
    %17 = math.exp %16 : vector<8x128xf32>
    %cst_12 = arith.constant dense<0.000000e+00> : vector<8xf32>
    %18 = vector.multi_reduction <add>, %17, %cst_12 [1] : vector<8x128xf32> to vector<8xf32>
    %19 = vector.shape_cast %18 : vector<8xf32> to vector<8x1xf32>
    %20 = vector.broadcast %19 : vector<8x1xf32> to vector<8x128xf32>
    %21 = arith.divf %17, %20 : vector<8x128xf32>
    %c0_13 = arith.constant 0 : index
    %c0_14 = arith.constant 0 : index
    %22 = vector.load %arg6[%c0_13, %c0_14] : memref<8x128xf32, #tpu.memory_space<vmem>>, vector<8x128xf32>
    tpu.vector_store %arg6[%c0_13, %c0_14], %21 {strides = array<i32>} : memref<8x128xf32, #tpu.memory_space<vmem>>, vector<8x128xf32>,
    return
  }
  func.func @transform_0(%arg0: i32) -> (i32, i32) {
    %c0_i32 = arith.constant 0 : i32
    %c0_i32_0 = arith.constant 0 : i32
    return %arg0, %c0_i32 : i32, i32
  }
  func.func @transform_1(%arg0: i32) -> (i32, i32) {
    %c0_i32 = arith.constant 0 : i32
    %c0_i32_0 = arith.constant 0 : i32
    %c0_i32_1 = arith.constant 0 : i32
    return %c0_i32, %c0_i32_0 : i32, i32
  }
  func.func @transform_2(%arg0: i32) -> (i32, i32) {
    %c0_i32 = arith.constant 0 : i32
    %c0_i32_0 = arith.constant 0 : i32
    %c0_i32_1 = arith.constant 0 : i32
    return %c0_i32, %c0_i32_0 : i32, i32
  }
  func.func @transform_3(%arg0: i32) -> (i32, i32) {
    %c0_i32 = arith.constant 0 : i32
    %c0_i32_0 = arith.constant 0 : i32
    %c0_i32_1 = arith.constant 0 : i32
    return %c0_i32, %c0_i32_0 : i32, i32
  }
  func.func @transform_4(%arg0: i32) -> (i32, i32) {
    %c0_i32 = arith.constant 0 : i32
    %c0_i32_0 = arith.constant 0 : i32
    %c0_i32_1 = arith.constant 0 : i32
    return %c0_i32, %c0_i32_0 : i32, i32
  }
  func.func @transform_5(%arg0: i32) -> (i32, i32) {
    %c0_i32 = arith.constant 0 : i32
    %c0_i32_0 = arith.constant 0 : i32
    return %arg0, %c0_i32 : i32, i32
  }
}

</mosaic_0001>

<bundles_post_ra>
// kernel: two_layer_net.1
= control target key start
LH: loop header
LB: loop body
LE: loop exit
PB: predicated region body
PF: predicated region fallthrough
CT: control target
= control target key end

     0   :  { %10 = vsyncpa [#allocation3], 0  ;;  %s736_s0 = inlined_call_operand.hbm [shape: f32[8,128], index: 0, kind: input, shape index: {}]   ;;  %s737_s1 = inlined_call_operand.hbm [shape: f32[128,128], index: 1, kind: input, shape index: {}]   ;;  %s738_s2 = inlined_call_operand.hbm [shape: f32[1,128], index: 2, kind: input, shape index: {}]   ;;  %s739_s3 = inlined_call_operand.hbm [shape: f32[128,128], index: 3, kind: input, shape index: {}]   ;;  %s740_s4 = inlined_call_operand.hbm [shape: f32[1,128], index: 4, kind: input, shape index: {}]   ;;  %s741_s5 = inlined_call_operand.hbm [shape: f32[8,128], index: 5, kind: output, shape index: {}]  }
   0x1   :  { %11 = vsyncpa [#allocation6], 0 }
   0x2   :  { %12 = vsyncpa [#allocation9], 0 }
   0x3   :  { %13 = vsyncpa [#allocation4], 0  ;;  %s607_s18 = smov [#allocation5]   ;;  %s467_s22 = scalar_lea.hbm %s737_s1, 2048 }
   0x4   :  { %s29_s19 = sshll.u32 %s607_s18, 4  ;;  %p468_p0 = scmp.ne.s32.totalorder %s737_s1, %s467_s22  ;;  %s30_s19 = int_to_ptr.vmem [resolvable:$true] %s29_s19 }
   0x5   :  { %p471_p1 = scmp.lt.u32.totalorder %s467_s22, %s737_s1 }
   0x7   :  { %p473_p2 = pnand %p471_p1, %p468_p0 }
   0x9   :  { %476 = shalt.err (!%p473_p2)
}
   0xa   :  { %s477_s27 = scalar_lea.vmem %s30_s19, 2048  ;;  %p482_p4 = scmp.lt.s32.totalorder %s30_s19, %s30_s19 }
   0xb   :  { %p478_p3 = scmp.ne.s32.totalorder %s30_s19, %s477_s27  ;;  %p483_p5 = scmp.lt.s32.totalorder %s477_s27, %s477_s27 }
   0xd   :  { %p484_p6 = por %p483_p5, %p482_p4 }
   0xf   :  { %p485_p7 = pnand %p484_p6, %p478_p3 }
  0x11   :  { %488 = shalt.err (!%p485_p7)
}
  0x12   :  { %s608_s28 = smov 128   ;;  %s609_s29 = smov 8  }
  0x13   :  { %35 = dma.hbm_to_vmem [thread:$0]  %s737_s1, 2048, %s30_s19, [#allocation6], %s608_s28, %s608_s28, %s609_s29  }
  0x14   :  { %s610_s7 = smov [#allocation8]   ;;  %s611_s9 = smov [#allocation2]  }
  0x15   :  { %s51_s8 = sshll.u32 %s610_s7, 4  ;;  %s20_s10 = sshll.u32 %s611_s9, 4  ;;  %s52_s8 = int_to_ptr.vmem [resolvable:$true] %s51_s8  ;;  %s21_s10 = int_to_ptr.vmem [resolvable:$true] %s20_s10 }
  0x16   :  { %s489_s13 = scalar_lea.hbm %s739_s3, 2048 }
  0x17   :  { %p490_p8 = scmp.ne.s32.totalorder %s739_s3, %s489_s13  ;;  %p493_p9 = scmp.lt.u32.totalorder %s489_s13, %s739_s3 }
  0x19   :  { %p495_p10 = pnand %p493_p9, %p490_p8 }
  0x1b   :  { %498 = shalt.err (!%p495_p10)
}
  0x1c   :  { %s499_s1 = scalar_lea.vmem %s52_s8, 2048  ;;  %p504_p12 = scmp.lt.s32.totalorder %s52_s8, %s52_s8 }
  0x1d   :  { %p500_p11 = scmp.ne.s32.totalorder %s52_s8, %s499_s1  ;;  %p505_p13 = scmp.lt.s32.totalorder %s499_s1, %s499_s1 }
  0x1f   :  { %p506_p0 = por %p505_p13, %p504_p12 }
  0x21   :  { %p507_p1 = pnand %p506_p0, %p500_p11 }
  0x23   :  { %510 = shalt.err (!%p507_p1)
}
  0x24   :  { %57 = dma.hbm_to_vmem [thread:$0]  %s739_s3, 2048, %s52_s8, [#allocation9], %s608_s28, %s608_s28, %s609_s29  }
  0x25   :  { %s511_s22 = scalar_lea.hbm %s736_s0, 128 }
  0x26   :  { %p512_p2 = scmp.ne.s32.totalorder %s736_s0, %s511_s22  ;;  %p515_p3 = scmp.lt.u32.totalorder %s511_s22, %s736_s0 }
  0x28   :  { %p517_p4 = pnand %p515_p3, %p512_p2 }
  0x2a   :  { %520 = shalt.err (!%p517_p4)
}
  0x2b   :  { %s521_s27 = scalar_lea.vmem %s21_s10, 128  ;;  %p526_p6 = scmp.lt.s32.totalorder %s21_s10, %s21_s10 }
  0x2c   :  { %p522_p5 = scmp.ne.s32.totalorder %s21_s10, %s521_s27  ;;  %p527_p7 = scmp.lt.s32.totalorder %s521_s27, %s521_s27 }
  0x2e   :  { %p528_p8 = por %p527_p7, %p526_p6 }
  0x30   :  { %p529_p9 = pnand %p528_p8, %p522_p5 }
  0x32   :  { %532 = shalt.err (!%p529_p9)
}
  0x33   :  { %23 = dma.hbm_to_vmem [thread:$0]  %s736_s0, 128, %s21_s10, [#allocation3]  }
  0x34   :  { %s612_s29 = smov [#allocation7]   ;;  %s613_s6 = smov [#allocation10]  }
  0x35   :  { %s42_s30 = sshll.u32 %s612_s29, 4  ;;  %s64_s7 = sshll.u32 %s613_s6, 4  ;;  %s43_s30 = int_to_ptr.vmem [resolvable:$true] %s42_s30  ;;  %s65_s7 = int_to_ptr.vmem [resolvable:$true] %s64_s7 }
  0x36   :  { %s533_s11 = scalar_lea.hbm %s738_s2, 16 }
  0x37   :  { %p534_p10 = scmp.ne.s32.totalorder %s738_s2, %s533_s11  ;;  %p537_p11 = scmp.lt.u32.totalorder %s533_s11, %s738_s2 }
  0x39   :  { %p539_p12 = pnand %p537_p11, %p534_p10 }
  0x3b   :  { %542 = shalt.err (!%p539_p12)
}
  0x3c   :  { %s543_s0 = scalar_lea.vmem %s43_s30, 16  ;;  %s547_s10 = scalar_lea.vmem %s43_s30, 32 }
  0x3d   :  { %p544_p13 = scmp.ne.s32.totalorder %s43_s30, %s543_s0  ;;  %p548_p0 = scmp.lt.s32.totalorder %s43_s30, %s43_s30 }
  0x3e   :  { %p549_p1 = scmp.lt.s32.totalorder %s547_s10, %s543_s0 }
  0x40   :  { %p550_p2 = por %p549_p1, %p548_p0 }
  0x42   :  { %p551_p3 = pnand %p550_p2, %p544_p13 }
  0x44   :  { %554 = shalt.err (!%p551_p3)
}
  0x45   :  { %45 = dma.hbm_to_vmem [thread:$0]  %s738_s2, 16, %s43_s30, [#allocation6]  }
  0x46   :  { %s555_s19 = scalar_lea.hbm %s740_s4, 16 }
  0x47   :  { %p556_p4 = scmp.ne.s32.totalorder %s740_s4, %s555_s19  ;;  %p559_p5 = scmp.lt.u32.totalorder %s555_s19, %s740_s4 }
  0x49   :  { %p561_p6 = pnand %p559_p5, %p556_p4 }
  0x4b   :  { %564 = shalt.err (!%p561_p6)
}
  0x4c   :  { %s565_s24 = scalar_lea.vmem %s65_s7, 16  ;;  %s569_s25 = scalar_lea.vmem %s65_s7, 32 }
  0x4d   :  { %p566_p7 = scmp.ne.s32.totalorder %s65_s7, %s565_s24  ;;  %p570_p8 = scmp.lt.s32.totalorder %s65_s7, %s65_s7 }
  0x4e   :  { %p571_p9 = scmp.lt.s32.totalorder %s569_s25, %s565_s24 }
  0x50   :  { %p572_p10 = por %p571_p9, %p570_p8 }
  0x52   :  { %p573_p11 = pnand %p572_p10, %p566_p7 }
  0x54   :  { %576 = shalt.err (!%p573_p11)
}
  0x55   :  { %67 = dma.hbm_to_vmem [thread:$0]  %s740_s4, 16, %s65_s7, [#allocation9]  }
  0x56   :  { %599 = dma.done.wait [#allocation3], 128  }
  0x57   :  { %600 = vsyncadd [#allocation3], 4294967168 }
  0x58   :  { %601 = dma.done.wait [#allocation6], 2064  }
  0x59   :  { %602 = vsyncadd [#allocation6], 4294965232 }
  0x5a   :  { %603 = dma.done.wait [#allocation9], 2064  }
  0x5b   :  { %604 = vsyncadd [#allocation9], 4294965232  ;;  %v614_v0 = vmov 0.0|0.0   ;;  %vm615_vm0 = vmmov 0   ;;  %v616_v1 = vmov 0.0   ;;  %v84_v2 = vld [vmem:[#allocation5] sm:$0xff] }
  0x5c   :  { %404 = vmatprep.subr.bf16.mxu0 %v614_v0  ;;  %366 = vmatprep.mubr.msk.f32.mxu0 %vm615_vm0, %v616_v1  ;;  %v85_v3 = vld [vmem:[#allocation5 + $0x8] sm:$0xff]  ;;  %v86_v4 = vld [vmem:[#allocation5 + $0x10] sm:$0xff]  ;;  %v87_v6 = vld [vmem:[#allocation5 + $0x18] sm:$0xff]  ;;  %s617_s4 = smov [#allocation11]  }
  0x5d   :  { %428 = vmatprep.subr.bf16.mxu1 %v614_v0  ;;  %401 = vmatprep.mubr.msk.f32.mxu1 %vm615_vm0, %v616_v1  ;;  %v405_v5 = vpack.c.bf16 %v85_v3, %v84_v2  ;;  %v408_v7 = vpack.c.bf16 %v87_v6, %v86_v4  ;;  %v88_v8 = vld [vmem:[#allocation5 + $0x20] sm:$0xff]  ;;  %v89_v9 = vld [vmem:[#allocation5 + $0x28] sm:$0xff]  ;;  %v180_v12 = vld [vmem:[#allocation8 + $0x10] sm:$0xff]  ;;  %s287_s27 = sshll.u32 %s617_s4, 4  ;;  %s288_s27 = int_to_ptr.vmem [resolvable:$true] %s287_s27 }
  0x5e   :  { %v178_v10 = vld [vmem:[#allocation8] sm:$0xff]  ;;  %v179_v11 = vld [vmem:[#allocation8 + $0x8] sm:$0xff]  ;;  %v181_v13 = vld [vmem:[#allocation8 + $0x18] sm:$0xff]  ;;  %v411_v14 = vpack.c.bf16 %v89_v9, %v88_v8  ;;  %s577_s3 = scalar_lea.vmem %s288_s27, 128  ;;  %p582_p13 = scmp.lt.s32.totalorder %s288_s27, %s288_s27 }
  0x5f   :  { %406 = vmatpush3.bf16.msra.mxu0 %v405_v5  ;;  %v429_v15 = vpack.c.bf16 %v179_v11, %v178_v10  ;;  %v90_v16 = vld [vmem:[#allocation5 + $0x30] sm:$0xff]  ;;  %v91_v17 = vld [vmem:[#allocation5 + $0x38] sm:$0xff]  ;;  %v432_v18 = vpack.c.bf16 %v181_v13, %v180_v12  ;;  %v182_v19 = vld [vmem:[#allocation8 + $0x20] sm:$0xff]  ;;  %p578_p12 = scmp.ne.s32.totalorder %s288_s27, %s577_s3  ;;  %p583_p0 = scmp.lt.s32.totalorder %s577_s3, %s577_s3 }
  0x60   :  { %407 = vmatprep.subr.bf16.mxu0 %v614_v0  ;;  %v183_v20 = vld [vmem:[#allocation8 + $0x28] sm:$0xff]  ;;  %v414_v21 = vpack.c.bf16 %v91_v17, %v90_v16  ;;  %v92_v22 = vld [vmem:[#allocation5 + $0x40] sm:$0xff]  ;;  %v184_v25 = vld [vmem:[#allocation8 + $0x30] sm:$0xff] }
  0x61   :  { %430 = vmatpush3.bf16.msra.mxu1 %v429_v15  ;;  %v93_v23 = vld [vmem:[#allocation5 + $0x48] sm:$0xff]  ;;  %v435_v24 = vpack.c.bf16 %v183_v20, %v182_v19  ;;  %v185_v26 = vld [vmem:[#allocation8 + $0x38] sm:$0xff]  ;;  %v94_v28 = vld [vmem:[#allocation5 + $0x50] sm:$0xff]  ;;  %p584_p1 = por %p583_p0, %p582_p13 }
  0x62   :  { %431 = vmatprep.subr.bf16.mxu1 %v614_v0  ;;  %v417_v27 = vpack.c.bf16 %v93_v23, %v92_v22  ;;  %v95_v29 = vld [vmem:[#allocation5 + $0x58] sm:$0xff]  ;;  %v438_v30 = vpack.c.bf16 %v185_v26, %v184_v25  ;;  %v186_v31 = vld [vmem:[#allocation8 + $0x40] sm:$0xff]  ;;  %v187_v32 = vld [vmem:[#allocation8 + $0x48] sm:$0xff] }
  0x63   :  { %409 = vmatpush3.bf16.msra.mxu0 %v408_v7  ;;  %v420_v33 = vpack.c.bf16 %v95_v29, %v94_v28  ;;  %v96_v34 = vld [vmem:[#allocation5 + $0x60] sm:$0xff]  ;;  %v97_v35 = vld [vmem:[#allocation5 + $0x68] sm:$0xff]  ;;  %v441_v36 = vpack.c.bf16 %v187_v32, %v186_v31  ;;  %v188_v37 = vld [vmem:[#allocation8 + $0x50] sm:$0xff]  ;;  %p585_p2 = pnand %p584_p1, %p578_p12 }
  0x64   :  { %410 = vmatprep.subr.bf16.mxu0 %v614_v0  ;;  %v189_v38 = vld [vmem:[#allocation8 + $0x58] sm:$0xff]  ;;  %v423_v39 = vpack.c.bf16 %v97_v35, %v96_v34  ;;  %v98_v40 = vld [vmem:[#allocation5 + $0x70] sm:$0xff]  ;;  %v190_v43 = vld [vmem:[#allocation8 + $0x60] sm:$0xff] }
  0x65   :  { %433 = vmatpush3.bf16.msra.mxu1 %v432_v18  ;;  %v99_v41 = vld [vmem:[#allocation5 + $0x78] sm:$0xff]  ;;  %v444_v42 = vpack.c.bf16 %v189_v38, %v188_v37  ;;  %v191_v44 = vld [vmem:[#allocation8 + $0x68] sm:$0xff]  ;;  %v298_v51 = vld [vmem:[#allocation7] ss:$0 sm:$0xff] }
  0x66   :  { %434 = vmatprep.subr.bf16.mxu1 %v614_v0  ;;  %v426_v45 = vpack.c.bf16 %v99_v41, %v98_v40  ;;  %v447_v46 = vpack.c.bf16 %v191_v44, %v190_v43  ;;  %v83_v47 = vld [vmem:[#allocation2] sm:$0xff]  ;;  %v299_v56 = vld [vmem:[#allocation10] ss:$0 sm:$0xff] }
  0x67   :  { %412 = vmatpush3.bf16.msra.mxu0 %v411_v14  ;;  %v192_v48 = vld [vmem:[#allocation8 + $0x70] sm:$0xff]  ;;  %v193_v49 = vld [vmem:[#allocation8 + $0x78] sm:$0xff] }
  0x68   :  { %413 = vmatprep.subr.bf16.mxu0 %v614_v0  ;;  %v450_v50 = vpack.c.bf16 %v193_v49, %v192_v48 }
  0x69   :  { %436 = vmatpush3.bf16.msra.mxu1 %v435_v24 }
  0x6a   :  { %437 = vmatprep.subr.bf16.mxu1 %v614_v0 }
  0x6b   :  { %415 = vmatpush3.bf16.msra.mxu0 %v414_v21 }
  0x6c   :  { %416 = vmatprep.subr.bf16.mxu0 %v614_v0 }
  0x6d   :  { %439 = vmatpush3.bf16.msra.mxu1 %v438_v30 }
  0x6e   :  { %440 = vmatprep.subr.bf16.mxu1 %v614_v0 }
  0x6f   :  { %418 = vmatpush3.bf16.msra.mxu0 %v417_v27 }
  0x70   :  { %419 = vmatprep.subr.bf16.mxu0 %v614_v0 }
  0x71   :  { %442 = vmatpush3.bf16.msra.mxu1 %v441_v36 }
  0x72   :  { %443 = vmatprep.subr.bf16.mxu1 %v614_v0 }
  0x73   :  { %421 = vmatpush3.bf16.msra.mxu0 %v420_v33 }
  0x74   :  { %422 = vmatprep.subr.bf16.mxu0 %v614_v0 }
  0x75   :  { %445 = vmatpush3.bf16.msra.mxu1 %v444_v42 }
  0x76   :  { %446 = vmatprep.subr.bf16.mxu1 %v614_v0 }
  0x77   :  { %424 = vmatpush3.bf16.msra.mxu0 %v423_v39 }
  0x78   :  { %425 = vmatprep.subr.bf16.mxu0 %v614_v0 }
  0x79   :  { %448 = vmatpush3.bf16.msra.mxu1 %v447_v46 }
  0x7a   :  { %449 = vmatprep.subr.bf16.mxu1 %v614_v0 }
  0x7b   :  { %427 = vmatpush3.bf16.msra.mxu0 %v426_v45 }
  0x7d   :  { %451 = vmatpush3.bf16.msra.mxu1 %v450_v50 }
  0x7e   :  { %367 = vmatmul.mubr.f32.vlgmr.msra.gmra.mrb[0].mxu0 %v83_v47 }
 0x151   :  { %v173_v52 = vpop.f32.mrb[0].mxu0 }
 0x152   :  { %v174_v53 = vadd.f32 %v298_v51, %v173_v52  ;;  %v368_v54 = vpop.f32.mrb[1].mxu0 }
 0x154   :  { %v177_v55 = vmax.f32 %v174_v53, 0.0 }
 0x156   :  { %402 = vmatmul.mubr.f32.vlgmr.msra.gmra.mrb[0].mxu1 %v177_v55 }
 0x229   :  { %v267_v57 = vpop.f32.mrb[0].mxu1 }
 0x22a   :  { %v268_v58 = vadd.f32 %v299_v56, %v267_v57  ;;  %v403_v59 = vpop.f32.mrb[1].mxu1 }
 0x22c   :  { %271 = vmax.xlane.f32.xlu0 %v268_v58 }
 0x2b9   :  { %v272_v60 = vpop.xlane.xlu0 %271 }
 0x2ba   :  { %v273_v61 = vsub.f32 %v268_v58, %v272_v60 }
 0x2bc   :  { %v274_v62 = vmul.f32 1.442695, %v273_v61 }
 0x2be   :  { %463 = vpow2.f32 %v274_v62 }
 0x2c8   :  { %v464_v63 = vpop.eup %463 }
 0x2c9   :  { %276 = vadd.xlane.f32.xlu0 %v464_v63 }
 0x356   :  { %v277_v0 = vpop.xlane.xlu0 %276 }
 0x357   :  { %465 = vrcp.f32 %v277_v0 }
 0x361   :  { %v466_v1 = vpop.eup %465 }
 0x362   :  { %v279_v2 = vmul.f32 %v466_v1, %v464_v63 }
 0x364   :  { %280 = vst [vmem:[#allocation11] sm:$0xff] %v279_v2 }
 0x365   :  { %588 = shalt.err (!%p585_p2)
}
 0x366   :  { %s589_s30 = scalar_lea.hbm %s741_s5, 128 }
 0x367   :  { %p590_p3 = scmp.ne.s32.totalorder %s741_s5, %s589_s30  ;;  %p593_p4 = scmp.lt.u32.totalorder %s589_s30, %s741_s5 }
 0x369   :  { %p595_p5 = pnand %p593_p4, %p590_p3 }
 0x36b   :  { %598 = shalt.err (!%p595_p5)
}
 0x36c   :  { %290 = dma.vmem_to_hbm [thread:$0]  %s288_s27, 128, %s741_s5, [#allocation4]  }
 0x36d   :  { %605 = dma.done.wait [#allocation4], 128  }
 0x36e   :  { %606 = vsyncadd [#allocation4], 4294967168 }
 0x36f   :  { %294 = vsyncpa [#allocation3], 1 }
 0x370   :  { %295 = vsyncpa [#allocation6], 1 }
 0x371   :  { %296 = vsyncpa [#allocation9], 1 }
 0x372   :  { %297 = vsyncpa [#allocation4], 1 }

</bundles_post_ra>
